<compile_context>
chip_gen: v6e
topology: v6e:2x2x1
jax: 0.10.0
libtpu: 0.0.40
codegen_flags: <defaults>
</compile_context>

<pallas_src>
import functools

import jax
import jax.numpy as jnp
from jax.experimental import pallas as pl
from jax.experimental.pallas import tpu as pltpu

LRELU_SLOPE = 0.2
BN_EPS = 1e-5
LAMBDA_L1 = 100.0
REAL_LABEL = 1.0
FAKE_LABEL = 0.0
K = 4                                   # every PatchDiscriminator conv is k=4, p=1
_LHS_SCRATCH_BUDGET = 6 * 1024 * 1024   # cap on the per-tile im2col VMEM scratch


# --------------------------- small helpers -----------------------------------

def _round_up(x, m):
    return ((x + m - 1) // m) * m


def _vmem_limit_bytes():
    """Generation-aware scoped-VMEM limit (~48 MiB on v7x, ~96 MiB on v5e/v6e)."""
    cap = 64 * 1024 * 1024
    try:
        cap = int(getattr(pltpu.get_tpu_info(), "vmem_capacity_bytes", cap))
    except Exception:
        pass
    return min(cap * 3 // 4, 112 * 1024 * 1024)


_VMEM_LIMIT = _vmem_limit_bytes()


def _pick_row_tile(oh, owp, cin):
    """Output-row tile TR: keep the (TR*OWp, K*K*Cin) bf16 LHS scratch bounded
    while making the matmul M dimension as large as possible (<= 1024 rows)."""
    max_m = (_LHS_SCRATCH_BUDGET // (K * K * cin * 2)) // owp * owp
    target_m = min(1024, max(owp, max_m))
    tr = max(1, target_m // owp)
    tr = min(tr, oh)
    ohp = _round_up(oh, tr)
    return tr, ohp, ohp // tr


def _space_to_phases(x, stride, ohp, owp, rh):
    """Zero-pad H/W and split into stride*stride phase planes sized exactly for
    the row-tiled kernel: plane[b*s*s + a*s + c, i, j] == padded[b, s*i+a, s*j+c],
    so every conv tap (kh, kw) is a contiguous window of one phase plane."""
    B, H, W, C = x.shape
    hq, wq = ohp + rh, owp + rh
    xp = jnp.pad(x, ((0, 0), (1, stride * hq - H - 1),
                     (1, stride * wq - W - 1), (0, 0)))
    if stride == 1:
        return xp, hq, wq
    xq = xp.reshape(B, hq, stride, wq, stride, C)
    xq = jnp.transpose(xq, (0, 2, 4, 1, 3, 5))
    return xq.reshape(B * stride * stride, hq, wq, C), hq, wq


# --------------------------- Pallas kernels -----------------------------------

def conv_im2col_kernel(*refs, stride, TR, OWp, Cin, Cout, rh, fuse_in, final,
                       H_in, W_in, OH, OW):
    """Conv2d(k=4, p=1) for one (batch, output-row-tile) grid point.

    Optionally fuses the producer's BatchNorm apply + LeakyReLU(0.2) onto the
    loaded input window (`fuse_in`), builds a tile-scoped im2col LHS in a VMEM
    scratch and performs a single bf16 MXU matmul with f32 accumulation.
    Non-final layers also emit masked per-tile channel sum / sum-of-squares for
    the two-pass train-mode BatchNorm of the next layer.
    """
    i = 0
    x_ref = refs[i]; i += 1
    w_ref = refs[i]; i += 1
    if fuse_in:
        scale_ref, shift_ref = refs[i], refs[i + 1]; i += 2
    if final:
        bias_ref = refs[i]; i += 1
    out_ref = refs[i]; i += 1
    if not final:
        stat_ref = refs[i]; i += 1
    lhs_ref = refs[i]; i += 1
    win_ref = refs[i] if fuse_in else None

    r = pl.program_id(1)
    row0 = r * TR
    if TR % 8 == 0:
        row0 = pl.multiple_of(row0, TR)
    S2 = stride * stride
    TRW = TR + rh
    Wq = OWp + rh
    M = TR * OWp

    if fuse_in:
        # Producer BN apply + LeakyReLU fused onto this layer's input window;
        # conv-pad / alignment-pad positions are re-zeroed via an iota mask.
        for p in range(S2):
            a, c = p // stride, p % stride
            win = x_ref[p, pl.ds(row0, TRW), :, :].astype(jnp.float32)
            y = win * scale_ref[...] + shift_ref[...]
            y = jnp.where(y >= 0.0, y, LRELU_SLOPE * y)
            ri = jax.lax.broadcasted_iota(jnp.int32, (TRW, Wq, Cin), 0)
            ci = jax.lax.broadcasted_iota(jnp.int32, (TRW, Wq, Cin), 1)
            prow = stride * (row0 + ri) + a
            pcol = stride * ci + c
            valid = ((prow >= 1) & (prow <= H_in) & (pcol >= 1) & (pcol <= W_in))
            win_ref[p] = jnp.where(valid, y, 0.0).astype(jnp.bfloat16)

    # Tile-scoped im2col: contiguous (TR*OWp, K*K*Cin) LHS, then one MXU matmul.
    for kh in range(K):
        for kw in range(K):
            p = (kh % stride) * stride + (kw % stride)
            t = kh * K + kw
            if fuse_in:
                tap = win_ref[p, pl.ds(kh // stride, TR),
                              pl.ds(kw // stride, OWp), :]
            else:
                tap = x_ref[p, pl.ds(row0 + kh // stride, TR),
                            pl.ds(kw // stride, OWp), :]
            lhs_ref[:, t * Cin:(t + 1) * Cin] = tap.reshape(M, Cin)

    acc = jnp.dot(lhs_ref[...], w_ref[...], preferred_element_type=jnp.float32)

    if final:
        y = acc + bias_ref[...]
        out_ref[...] = y[:, 0:1].reshape(out_ref.shape)
    else:
        out_ref[...] = acc.reshape(out_ref.shape).astype(out_ref.dtype)
        # Masked BN statistics over the valid OH x OW output region only.
        ri = jax.lax.broadcasted_iota(jnp.int32, (TR, OWp, Cout), 0).reshape(M, Cout)
        ci = jax.lax.broadcasted_iota(jnp.int32, (TR, OWp, Cout), 1).reshape(M, Cout)
        valid = ((row0 + ri) < OH) & (ci < OW)
        accm = jnp.where(valid, acc, 0.0)
        s1 = jnp.sum(accm, axis=0, keepdims=True)
        s2 = jnp.sum(accm * accm, axis=0, keepdims=True)
        stat_ref[...] = jnp.concatenate([s1, s2], axis=0).reshape(stat_ref.shape)


def matmul_bias_lrelu_kernel(x_ref, w_ref, b_ref, o_ref):
    """Row-tiled (M, K*K*Cin) @ (K*K*Cin, Cout) + bias + LeakyReLU(0.2)."""
    y = jnp.dot(x_ref[...], w_ref[...], preferred_element_type=jnp.float32) + b_ref[...]
    o_ref[...] = jnp.where(y >= 0.0, y, LRELU_SLOPE * y).astype(o_ref.dtype)


def bce_two_sums_kernel(x_ref, o_ref, *, OH, OW):
    """Sums of BCE-with-logits terms over the valid OHxOW patch grid for both
    target labels (fake=0.0 and real=1.0); alignment-pad logits are masked."""
    x = x_ref[...]
    oh = jax.lax.broadcasted_iota(jnp.int32, x.shape, 1)
    ow = jax.lax.broadcasted_iota(jnp.int32, x.shape, 2)
    valid = (oh < OH) & (ow < OW)
    base = jnp.maximum(x, 0.0) + jnp.log1p(jnp.exp(-jnp.abs(x)))
    zero = jnp.zeros_like(x)
    o_ref[0] = jnp.sum(jnp.where(valid, base - x * FAKE_LABEL, zero))
    o_ref[1] = jnp.sum(jnp.where(valid, base - x * REAL_LABEL, zero))


def l1_partial_kernel(a_ref, b_ref, o_ref):
    """Per-tile partial |a-b| sums (parallel grid; reduced in XLA)."""
    p = jnp.sum(jnp.abs(a_ref[...].astype(jnp.float32)
                        - b_ref[...].astype(jnp.float32)))
    o_ref[...] = jnp.zeros(o_ref.shape, jnp.float32) + p


# --------------------------- layer wrappers -----------------------------------

def conv0_bias_lrelu(x, w, bias, *, stride=2):
    """First PatchDiscriminator layer (Cin=3): tiny XLA im2col of the 3-channel
    image feeding a row-tiled matmul + bias + LeakyReLU Pallas kernel."""
    B, H, W, Cin = x.shape
    Cout = w.shape[-1]
    OH = (H + 2 - K) // stride + 1
    OW = (W + 2 - K) // stride + 1
    xp = jnp.pad(x, ((0, 0), (1, 1), (1, 1), (0, 0)))
    cols = []
    for kh in range(K):
        for kw in range(K):
            cols.append(xp[:, kh:kh + (OH - 1) * stride + 1:stride,
                           kw:kw + (OW - 1) * stride + 1:stride, :])
    lhs = jnp.concatenate(cols, axis=-1).reshape(B * OH * OW, K * K * Cin)
    lhs = lhs.astype(jnp.bfloat16)
    M = B * OH * OW
    TM = min(512, _round_up(M, 8))
    Mp = _round_up(M, TM)
    if Mp > M:
        lhs = jnp.pad(lhs, ((0, Mp - M), (0, 0)))
    w2 = w.reshape(K * K * Cin, Cout).astype(jnp.bfloat16)
    b2 = bias.reshape(1, Cout).astype(jnp.float32)
    out = pl.pallas_call(
        matmul_bias_lrelu_kernel,
        out_shape=jax.ShapeDtypeStruct((Mp, Cout), jnp.bfloat16),
        grid=(Mp // TM,),
        in_specs=[pl.BlockSpec((TM, K * K * Cin), lambda i: (i, 0)),
                  pl.BlockSpec((K * K * Cin, Cout), lambda i: (0, 0)),
                  pl.BlockSpec((1, Cout), lambda i: (0, 0))],
        out_specs=pl.BlockSpec((TM, Cout), lambda i: (i, 0)),
        compiler_params=pltpu.CompilerParams(
            dimension_semantics=("parallel",), vmem_limit_bytes=_VMEM_LIMIT),
    )(lhs, w2, b2)
    return out[:M].reshape(B, OH, OW, Cout)


def conv_block(x, fuse, w, *, stride, bias=None, final=False):
    """Conv2d(k=4, p=1, stride) over NHWC `x`.

    `fuse` is None or (scale, shift): when set, `x` is the producer's raw
    (pre-BN) conv output and BN-apply + LeakyReLU(0.2) is fused into this
    layer's input path.  Non-final layers return the raw (padded) conv output
    plus masked per-tile BN statistics; the final layer returns patch logits.
    """
    B, H, W, Cin = x.shape
    OH = (H + 2 - K) // stride + 1
    OW = (W + 2 - K) // stride + 1
    OWp = _round_up(OW, 8)
    TR, OHp, num_r = _pick_row_tile(OH, OWp, Cin)
    rh = (K - 1) // stride
    S2 = stride * stride
    M = TR * OWp

    xq, Hq, Wq = _space_to_phases(x.astype(jnp.bfloat16), stride, OHp, OWp, rh)

    if final:
        Coutp = 128            # pad the single output channel for a dense MXU rhs
        w2 = jnp.zeros((K * K * Cin, Coutp), jnp.bfloat16)
        w2 = w2.at[:, 0].set(w.reshape(K * K * Cin).astype(jnp.bfloat16))
        b2 = jnp.zeros((1, Coutp), jnp.float32)
        b2 = b2.at[0, 0].set(bias.reshape(()).astype(jnp.float32))
    else:
        Coutp = w.shape[-1]
        w2 = w.reshape(K * K * Cin, Coutp).astype(jnp.bfloat16)

    inputs = [xq, w2]
    in_specs = [pl.BlockSpec((S2, Hq, Wq, Cin), lambda b, r: (b, 0, 0, 0)),
                pl.BlockSpec((K * K * Cin, Coutp), lambda b, r: (0, 0))]
    if fuse is not None:
        scale, shift = fuse
        inputs += [scale.reshape(1, Cin).astype(jnp.float32),
                   shift.reshape(1, Cin).astype(jnp.float32)]
        in_specs += [pl.BlockSpec((1, Cin), lambda b, r: (0, 0)),
                     pl.BlockSpec((1, Cin), lambda b, r: (0, 0))]
    if final:
        inputs += [b2]
        in_specs += [pl.BlockSpec((1, Coutp), lambda b, r: (0, 0))]

    if final:
        out_shape = jax.ShapeDtypeStruct((B, num_r, M, 1), jnp.float32)
        out_specs = pl.BlockSpec((1, 1, M, 1), lambda b, r: (b, r, 0, 0))
    else:
        out_shape = (jax.ShapeDtypeStruct((B, OHp, OWp, Coutp), jnp.bfloat16),
                     jax.ShapeDtypeStruct((B, num_r, 2, Coutp), jnp.float32))
        out_specs = (pl.BlockSpec((1, TR, OWp, Coutp), lambda b, r: (b, r, 0, 0)),
                     pl.BlockSpec((1, 1, 2, Coutp), lambda b, r: (b, r, 0, 0)))

    scratch = [pltpu.VMEM((M, K * K * Cin), jnp.bfloat16)]
    if fuse is not None:
        scratch.append(pltpu.VMEM((S2, TR + rh, Wq, Cin), jnp.bfloat16))

    kern = functools.partial(
        conv_im2col_kernel, stride=stride, TR=TR, OWp=OWp, Cin=Cin, Cout=Coutp,
        rh=rh, fuse_in=fuse is not None, final=final,
        H_in=H, W_in=W, OH=OH, OW=OW)

    res = pl.pallas_call(
        kern, out_shape=out_shape, grid=(B, num_r),
        in_specs=in_specs, out_specs=out_specs,
        scratch_shapes=scratch,
        compiler_params=pltpu.CompilerParams(
            dimension_semantics=("parallel", "parallel"),
            vmem_limit_bytes=_VMEM_LIMIT),
    )(*inputs)

    if final:
        return res.reshape(B, OHp, OWp), OH, OW
    raw, stats = res
    return raw, stats, OH, OW


def bn_scale_shift(stats, gamma, beta, count):
    """Finalize exact global batch statistics -> per-channel scale/shift."""
    s = jnp.sum(stats, axis=(0, 1))                        # (2, Cout)
    mean = s[0] / count
    var = jnp.maximum(s[1] / count - mean * mean, 0.0)     # biased var, torch BN train
    scale = gamma.astype(jnp.float32) * jax.lax.rsqrt(var + BN_EPS)
    shift = beta.astype(jnp.float32) - mean * scale
    return scale, shift


def bce_two_sums(logits, OH, OW):
    """[sum BCE(logits, fake_label), sum BCE(logits, real_label)] over valid patches."""
    return pl.pallas_call(
        functools.partial(bce_two_sums_kernel, OH=OH, OW=OW),
        out_shape=jax.ShapeDtypeStruct((2,), jnp.float32),
        in_specs=[pl.BlockSpec(memory_space=pltpu.MemorySpace.VMEM)],
        out_specs=pl.BlockSpec(memory_space=pltpu.MemorySpace.SMEM),
    )(logits)


def l1_mean(a, b):
    """Mean |a-b| via lane-dense row tiles emitting parallel partial sums."""
    Wl = a.shape[-1]
    n = a.size
    R = n // Wl
    fa = a.astype(jnp.float32).reshape(R, Wl)
    fb = b.astype(jnp.float32).reshape(R, Wl)
    TRl = R
    if R > 512:
        for d in range(512, 7, -8):            # largest multiple-of-8 divisor of R
            if R % d == 0:
                TRl = d
                break
    nt = R // TRl
    parts = pl.pallas_call(
        l1_partial_kernel,
        out_shape=jax.ShapeDtypeStruct((nt, 8, 128), jnp.float32),
        grid=(nt,),
        in_specs=[pl.BlockSpec((TRl, Wl), lambda i: (i, 0)),
                  pl.BlockSpec((TRl, Wl), lambda i: (i, 0))],
        out_specs=pl.BlockSpec((1, 8, 128), lambda i: (i, 0, 0)),
        compiler_params=pltpu.CompilerParams(dimension_semantics=("parallel",)),
    )(fa, fb)
    return jnp.sum(parts[:, 0, 0]) / n


# --------------------------- model --------------------------------------------

def init_patch_discriminator(key, input_c=3, num_filters=64, n_down=3):
    """PatchDiscriminator(input_c=3, num_filters=64, n_down=3) parameter init."""
    layer_defs = [(input_c, num_filters, 2, False, True)]
    for i in range(n_down):
        layer_defs.append((num_filters * 2 ** i, num_filters * 2 ** (i + 1),
                           1 if i == n_down - 1 else 2, True, True))
    layer_defs.append((num_filters * 2 ** n_down, 1, 1, False, False))

    params = []
    for (cin, cout, stride, use_bn, act) in layer_defs:
        key, kw_, kb_ = jax.random.split(key, 3)
        w = jax.random.normal(kw_, (K, K, cin, cout), jnp.float32) * 0.02
        gamma = jnp.ones((cout,), jnp.float32)
        if use_bn:
            beta = jnp.zeros((cout,), jnp.float32)                       # BN shift
        else:
            beta = jax.random.normal(kb_, (cout,), jnp.float32) * 0.02   # conv bias
        params.append(dict(w=w, gamma=gamma, beta=beta,
                           stride=stride, use_bn=use_bn, act=act))
    return params


def discriminator_logits(params, x_nchw):
    """PatchDiscriminator.forward on an NCHW batch -> (padded patch logits, OH, OW)."""
    x = jnp.transpose(x_nchw, (0, 2, 3, 1)).astype(jnp.bfloat16)    # NCHW -> NHWC
    B = x.shape[0]
    p0 = params[0]
    h = conv0_bias_lrelu(x, p0["w"], p0["beta"], stride=p0["stride"])
    fuse = None
    for p in params[1:-1]:
        raw, stats, OH, OW = conv_block(h, fuse, p["w"], stride=p["stride"])
        scale, shift = bn_scale_shift(stats, p["gamma"], p["beta"],
                                      float(B * OH * OW))
        h = raw[:, :OH, :OW, :]            # drop alignment-pad rows / cols
        fuse = (scale, shift)              # BN apply fused into the next conv
    pf = params[-1]
    return conv_block(h, fuse, pf["w"], stride=pf["stride"],
                      bias=pf["beta"], final=True)


class MainModelPallas:
    """JAX/Pallas counterpart of MainModel's forward-path compute (loss values)."""

    def __init__(self, key, lambda_L1=LAMBDA_L1):
        self.lambda_L1 = lambda_L1
        self.disc_params = init_patch_discriminator(key, input_c=3)
        self._cache = None

    def setup_input(self, L, ab):
        self.L = L
        self.ab = ab
        self._cache = None

    def forward(self, fake_color_stand_in):
        # TODO(synk): net_G is an external ResNet18 DynamicUnet (architectures.dynamicunet.resnet18)
        # not defined in maingui.py; its forward cannot be reproduced, so fake_color is supplied.
        self.fake_color = fake_color_stand_in
        self._cache = None

    def _gan_losses(self):
        # Run the discriminator separately on the fake and the real batches so
        # train-mode BatchNorm statistics match the separate netD(fake) /
        # netD(real) passes of the PyTorch reference; the fake-pass results are
        # cached so backward_G does not re-run the discriminator.
        # TODO(synk): for jax.grad parity with torch .detach(), the D-loss path would
        # need lax.stop_gradient on fake_color (forward loss values are identical).
        if self._cache is None:
            fake_image = jnp.concatenate([self.L, self.fake_color], axis=1)
            real_image = jnp.concatenate([self.L, self.ab], axis=1)
            fake_logits, OH, OW = discriminator_logits(self.disc_params, fake_image)
            real_logits, _, _ = discriminator_logits(self.disc_params, real_image)
            n = fake_image.shape[0] * OH * OW
            f_sums = bce_two_sums(fake_logits, OH, OW)   # [vs fake_label, vs real_label]
            r_sums = bce_two_sums(real_logits, OH, OW)
            self._cache = (f_sums[0] / n, r_sums[1] / n, f_sums[1] / n)
        return self._cache

    def backward_D(self):
        loss_D_fake, loss_D_real, _ = self._gan_losses()
        loss_D = (loss_D_fake + loss_D_real) * 0.5
        return loss_D, loss_D_fake, loss_D_real

    def backward_G(self):
        _, _, loss_G_GAN = self._gan_losses()
        loss_G_L1 = l1_mean(self.fake_color, self.ab) * self.lambda_L1
        loss_G = loss_G_GAN + loss_G_L1
        return loss_G, loss_G_GAN, loss_G_L1


# --------------------------- main ----------------------------------------------

if __name__ == "__main__":
    key = jax.random.PRNGKey(0)
    k_param, k_L, k_ab, k_fake = jax.random.split(key, 4)

    B, H, W = 2, 32, 32                      # small stand-in for image_size=512
    L = jax.random.normal(k_L, (B, 1, H, W), jnp.float32)          # NCHW like torch
    ab = jax.random.normal(k_ab, (B, 2, H, W), jnp.float32)
    fake_color = jax.random.normal(k_fake, (B, 2, H, W), jnp.float32)  # stand-in for net_G(L)

    model = MainModelPallas(k_param)
    model.setup_input(L, ab)
    model.forward(fake_color)

    loss_D, loss_D_fake, loss_D_real = model.backward_D()
    loss_G, loss_G_GAN, loss_G_L1 = model.backward_G()

    jax.block_until_ready((loss_D, loss_D_fake, loss_D_real,
                           loss_G, loss_G_GAN, loss_G_L1))
    print("KERNEL_OK")
</pallas_src>

<mosaic_0001>
module attributes {stable_mosaic.version = 11 : i64} {
  func.func @matmul_bias_lrelu_kernel(%arg0: i32, %arg1: memref<512x48xbf16, #tpu.memory_space<vmem>>, %arg2: memref<48x64xbf16, #tpu.memory_space<vmem>>, %arg3: memref<1x64xf32, #tpu.memory_space<vmem>>, %arg4: memref<512x64xbf16, #tpu.memory_space<vmem>>) attributes {dimension_semantics = [#tpu.dimension_semantics<parallel>], iteration_bounds = array<i64: 1>, scalar_prefetch = 0 : i64, scratch_operands = 0 : i64, tpu.core_type = #tpu.core_type<tc>, window_params = [{transform_indices = @transform_0, window_bounds = array<i64: 512, 48>}, {pipeline_mode = #tpu.pipeline_mode<synchronous>, transform_indices = @transform_1, window_bounds = array<i64: 48, 64>}, {pipeline_mode = #tpu.pipeline_mode<synchronous>, transform_indices = @transform_2, window_bounds = array<i64: 1, 64>}, {transform_indices = @transform_3, window_bounds = array<i64: 512, 64>}]} {
    %c0 = arith.constant 0 : index
    %c0_0 = arith.constant 0 : index
    %0 = vector.load %arg1[%c0, %c0_0] : memref<512x48xbf16, #tpu.memory_space<vmem>>, vector<512x48xbf16>
    %c0_1 = arith.constant 0 : index
    %c0_2 = arith.constant 0 : index
    %1 = vector.load %arg2[%c0_1, %c0_2] : memref<48x64xbf16, #tpu.memory_space<vmem>>, vector<48x64xbf16>
    %cst = arith.constant dense<0.000000e+00> : vector<512x64xf32>
    %2 = tpu.matmul %0, %1, %cst {dimension_numbers = #tpu.dot_dimension_numbers<[1], [0], [0], [1], [0, 0, 1, 1], [], []>} : vector<512x48xbf16>, vector<48x64xbf16>, vector<512x64xf32> -> vector<512x64xf32>
    %c0_3 = arith.constant 0 : index
    %c0_4 = arith.constant 0 : index
    %3 = vector.load %arg3[%c0_3, %c0_4] : memref<1x64xf32, #tpu.memory_space<vmem>>, vector<1x64xf32>
    %4 = vector.broadcast %3 : vector<1x64xf32> to vector<512x64xf32>
    %5 = arith.addf %2, %4 : vector<512x64xf32>
    %cst_5 = arith.constant 0.000000e+00 : f32
    %6 = vector.broadcast %cst_5 : f32 to vector<512x64xf32>
    %7 = arith.cmpf oge, %5, %6 : vector<512x64xf32>
    %cst_6 = arith.constant 2.000000e-01 : f32
    %8 = vector.broadcast %cst_6 : f32 to vector<512x64xf32>
    %9 = arith.mulf %8, %5 : vector<512x64xf32>
    %10 = arith.select %7, %5, %9 : vector<512x64xi1>, vector<512x64xf32>
    %11 = arith.truncf %10 : vector<512x64xf32> to vector<512x64xbf16>
    %c0_7 = arith.constant 0 : index
    %c0_8 = arith.constant 0 : index
    %12 = vector.load %arg4[%c0_7, %c0_8] : memref<512x64xbf16, #tpu.memory_space<vmem>>, vector<512x64xbf16>
    tpu.vector_store %arg4[%c0_7, %c0_8], %11 {strides = array<i32>} : memref<512x64xbf16, #tpu.memory_space<vmem>>, vector<512x64xbf16>,
    return
  }
  func.func @transform_0(%arg0: i32) -> (i32, i32) {
    %c0_i32 = arith.constant 0 : i32
    %c0_i32_0 = arith.constant 0 : i32
    return %arg0, %c0_i32 : i32, i32
  }
  func.func @transform_1(%arg0: i32) -> (i32, i32) {
    %c0_i32 = arith.constant 0 : i32
    %c0_i32_0 = arith.constant 0 : i32
    %c0_i32_1 = arith.constant 0 : i32
    return %c0_i32, %c0_i32_0 : i32, i32
  }
  func.func @transform_2(%arg0: i32) -> (i32, i32) {
    %c0_i32 = arith.constant 0 : i32
    %c0_i32_0 = arith.constant 0 : i32
    %c0_i32_1 = arith.constant 0 : i32
    return %c0_i32, %c0_i32_0 : i32, i32
  }
  func.func @transform_3(%arg0: i32) -> (i32, i32) {
    %c0_i32 = arith.constant 0 : i32
    %c0_i32_0 = arith.constant 0 : i32
    return %arg0, %c0_i32 : i32, i32
  }
}

</mosaic_0001>

<bundles_post_ra>
// kernel: tpu_custom_call.1
= control target key start
LH: loop header
LB: loop body
LE: loop exit
PB: predicated region body
PF: predicated region fallthrough
CT: control target
= control target key end

     0   :  { %vm270_vm0 = vcmask 392192   ;;  %vm1104_vm3 = vcmask 519168   ;;  %s2024_s1 = inlined_call_operand.vmem [shape: bf16[48,64], index: 1, kind: input, shape index: {}]   ;;  %s2025_s0 = inlined_call_operand.vmem [shape: bf16[512,48], index: 0, kind: input, shape index: {}]   ;;  %s2026_s2 = inlined_call_operand.vmem [shape: f32[1,64], index: 2, kind: input, shape index: {}]   ;;  %s2027_s3 = inlined_call_operand.vmem [shape: bf16[512,64], index: 3, kind: output, shape index: {}]  }
   0x1   :  { %v1480_v0 = vld [vmem:[%s2024_s1 + $0x10] sm:$0xff]   ;;  %v1481_v1 = vld [vmem:[%s2024_s1 + $0x8] sm:$0xff]   ;;  %v1482_v2 = vld [vmem:[%s2024_s1] sm:$0xff]  }
   0x2   :  { %1404 = vmatprep.subr.bf16.mxu0 %v1480_v0  ;;  %1474 = vmatprep.subr.bf16.mxu1 %v1480_v0  ;;  %v1483_v3 = vld [vmem:[%s2025_s0] sm:$0xff]   ;;  %v1485_v5 = vld [vmem:[%s2025_s0 + $0x8] sm:$0xff]   ;;  %v1487_v7 = vld [vmem:[%s2025_s0 + $0x10] sm:$0xff]  }
   0x3   :  { %1405 = vmatpush3.bf16.msra.mxu0 %v1480_v0  ;;  %1477 = vmatpush3.bf16.msra.mxu1 %v1480_v0  ;;  %v1484_v4 = vld [vmem:[%s2025_s0 + $0x80] sm:$0xff]   ;;  %v1486_v6 = vld [vmem:[%s2025_s0 + $0x88] sm:$0xff]   ;;  %v1488_v8 = vld [vmem:[%s2025_s0 + $0x90] sm:$0xff]  }
   0x4   :  { %1406 = vmatprep.subr.bf16.mxu0 %v1481_v1  ;;  %1475 = vmatprep.subr.bf16.mxu1 %v1481_v1  ;;  %v1489_v9 = vld [vmem:[%s2025_s0 + $0x18] sm:$0xff]   ;;  %v1491_v11 = vld [vmem:[%s2025_s0 + $0x20] sm:$0xff]   ;;  %v1493_v13 = vld [vmem:[%s2025_s0 + $0x28] sm:$0xff]  }
   0x5   :  { %1410 = vmatprep.mubr.msk.bf16.mxu0 %vm270_vm0, %v1483_v3  ;;  %1442 = vmatprep.mubr.msk.bf16.mxu1 %vm270_vm0, %v1484_v4  ;;  %v1490_v10 = vld [vmem:[%s2025_s0 + $0x98] sm:$0xff]   ;;  %v1492_v12 = vld [vmem:[%s2025_s0 + $0xa0] sm:$0xff]   ;;  %v1494_v14 = vld [vmem:[%s2025_s0 + $0xa8] sm:$0xff]  }
   0x6   :  { %v1495_v15 = vld [vmem:[%s2025_s0 + $0x30] sm:$0xff]   ;;  %v1497_v17 = vld [vmem:[%s2025_s0 + $0x38] sm:$0xff]   ;;  %v1499_v19 = vld [vmem:[%s2025_s0 + $0x40] sm:$0xff]  }
   0x7   :  { %1407 = vmatpush3.bf16.msra.mxu0 %v1481_v1  ;;  %1478 = vmatpush3.bf16.msra.mxu1 %v1481_v1  ;;  %v1496_v16 = vld [vmem:[%s2025_s0 + $0xb0] sm:$0xff]   ;;  %v1498_v18 = vld [vmem:[%s2025_s0 + $0xb8] sm:$0xff]   ;;  %v1500_v20 = vld [vmem:[%s2025_s0 + $0xc0] sm:$0xff]  }
   0x8   :  { %1408 = vmatprep.subr.bf16.mxu0 %v1482_v2  ;;  %1476 = vmatprep.subr.bf16.mxu1 %v1482_v2  ;;  %v1501_v21 = vld [vmem:[%s2025_s0 + $0x48] sm:$0xff]   ;;  %v1503_v23 = vld [vmem:[%s2025_s0 + $0x50] sm:$0xff]   ;;  %v1505_v25 = vld [vmem:[%s2025_s0 + $0x58] sm:$0xff]  }
   0x9   :  { %v1502_v22 = vld [vmem:[%s2025_s0 + $0xc8] sm:$0xff]   ;;  %v1504_v24 = vld [vmem:[%s2025_s0 + $0xd0] sm:$0xff]   ;;  %v1506_v26 = vld [vmem:[%s2025_s0 + $0xd8] sm:$0xff]  }
   0xa   :  { %v1507_v27 = vld [vmem:[%s2025_s0 + $0x60] sm:$0xff]   ;;  %v1509_v29 = vld [vmem:[%s2025_s0 + $0x68] sm:$0xff]   ;;  %v1511_v31 = vld [vmem:[%s2025_s0 + $0x70] sm:$0xff]  }
   0xb   :  { %1409 = vmatpush3.bf16.msra.mxu0 %v1482_v2  ;;  %1479 = vmatpush3.bf16.msra.mxu1 %v1482_v2  ;;  %v1508_v28 = vld [vmem:[%s2025_s0 + $0xe0] sm:$0xff]   ;;  %v1510_v30 = vld [vmem:[%s2025_s0 + $0xe8] sm:$0xff]   ;;  %v1512_v32 = vld [vmem:[%s2025_s0 + $0xf0] sm:$0xff]  }
   0xc   :  { %v1513_v33 = vld [vmem:[%s2025_s0 + $0x78] sm:$0xff]   ;;  %v1675_v35 = vld [vmem:[%s2026_s2] ss:$0 sm:$0xff] }
   0xd   :  { %v1514_v34 = vld [vmem:[%s2025_s0 + $0xf8] sm:$0xff]  }
   0xe   :  { %1411 = vmatmul.mubr.msk.bf16.vlgmr.msra.gmra.mxu0 %vm270_vm0, %v1485_v5  ;;  %1443 = vmatmul.mubr.msk.bf16.vlgmr.msra.gmra.mxu1 %vm270_vm0, %v1486_v6 }
   0xf   :  { %1414 = vmatprep.mubr.msk.bf16.mxu0 %vm270_vm0, %v1487_v7  ;;  %1446 = vmatprep.mubr.msk.bf16.mxu1 %vm270_vm0, %v1488_v8 }
  0x16   :  { %1415 = vmatmul.mubr.msk.bf16.gmra.mxu0 %vm270_vm0, %v1489_v9  ;;  %1447 = vmatmul.mubr.msk.bf16.gmra.mxu1 %vm270_vm0, %v1490_v10 }
  0x17   :  { %1418 = vmatprep.mubr.msk.bf16.mxu0 %vm270_vm0, %v1491_v11  ;;  %1450 = vmatprep.mubr.msk.bf16.mxu1 %vm270_vm0, %v1492_v12 }
  0x1e   :  { %1419 = vmatmul.mubr.msk.bf16.gmra.mxu0 %vm270_vm0, %v1493_v13  ;;  %1451 = vmatmul.mubr.msk.bf16.gmra.mxu1 %vm270_vm0, %v1494_v14 }
  0x1f   :  { %1422 = vmatprep.mubr.msk.bf16.mxu0 %vm270_vm0, %v1495_v15  ;;  %1454 = vmatprep.mubr.msk.bf16.mxu1 %vm270_vm0, %v1496_v16 }
  0x26   :  { %1423 = vmatmul.mubr.msk.bf16.gmra.mxu0 %vm270_vm0, %v1497_v17  ;;  %1455 = vmatmul.mubr.msk.bf16.gmra.mxu1 %vm270_vm0, %v1498_v18 }
  0x27   :  { %1426 = vmatprep.mubr.msk.bf16.mxu0 %vm270_vm0, %v1499_v19  ;;  %1458 = vmatprep.mubr.msk.bf16.mxu1 %vm270_vm0, %v1500_v20 }
  0x2e   :  { %1427 = vmatmul.mubr.msk.bf16.gmra.mxu0 %vm270_vm0, %v1501_v21  ;;  %1459 = vmatmul.mubr.msk.bf16.gmra.mxu1 %vm270_vm0, %v1502_v22 }
  0x2f   :  { %1430 = vmatprep.mubr.msk.bf16.mxu0 %vm270_vm0, %v1503_v23  ;;  %1462 = vmatprep.mubr.msk.bf16.mxu1 %vm270_vm0, %v1504_v24 }
  0x36   :  { %1431 = vmatmul.mubr.msk.bf16.gmra.mxu0 %vm270_vm0, %v1505_v25  ;;  %1463 = vmatmul.mubr.msk.bf16.gmra.mxu1 %vm270_vm0, %v1506_v26 }
  0x37   :  { %1434 = vmatprep.mubr.msk.bf16.mxu0 %vm270_vm0, %v1507_v27  ;;  %1466 = vmatprep.mubr.msk.bf16.mxu1 %vm270_vm0, %v1508_v28 }
  0x3e   :  { %1435 = vmatmul.mubr.msk.bf16.gmra.mxu0 %vm270_vm0, %v1509_v29  ;;  %1467 = vmatmul.mubr.msk.bf16.gmra.mxu1 %vm270_vm0, %v1510_v30 }
  0x3f   :  { %1438 = vmatprep.mubr.msk.bf16.mxu0 %vm270_vm0, %v1511_v31  ;;  %1470 = vmatprep.mubr.msk.bf16.mxu1 %vm270_vm0, %v1512_v32 }
  0x46   :  { %1439 = vmatmul.mubr.msk.bf16.gmra.mxu0 %vm270_vm0, %v1513_v33  ;;  %1471 = vmatmul.mubr.msk.bf16.gmra.mxu1 %vm270_vm0, %v1514_v34 }
  0xce   :  { %v1412_v36 = vpop.f32.mrf.mxu0  ;;  %v1444_v37 = vpop.f32.mrf.mxu1 }
  0xcf   :  { %v410_v38 = vadd.f32 %v1412_v36, %v1675_v35  ;;  %v538_v39 = vadd.f32 %v1444_v37, %v1675_v35 }
  0xd0   :  { %v401_v40 = vpop.f32.mrf.mxu0  ;;  %v529_v41 = vpop.f32.mrf.mxu1 }
  0xd1   :  { %vm658_vm1 = vcmp.ge.f32.partialorder %v410_v38, 0.0  ;;  %v722_v42 = vmul.f32 0.2, %v410_v38  ;;  %vm690_vm2 = vcmp.ge.f32.partialorder %v538_v39, 0.0  ;;  %v754_v43 = vmul.f32 0.2, %v538_v39 }
  0xd2   :  { %v402_v44 = vadd.f32 %v1675_v35, %v401_v40  ;;  %v530_v45 = vadd.f32 %v1675_v35, %v529_v41  ;;  %v1413_v46 = vpop.f32.mrf.mxu0  ;;  %v1445_v47 = vpop.f32.mrf.mxu1 }
  0xd3   :  { %v786_v48 = vsel %vm658_vm1, %v410_v38, %v722_v42  ;;  %v818_v49 = vsel %vm690_vm2, %v538_v39, %v754_v43  ;;  %v413_v50 = vadd.f32 %v1413_v46, %v1675_v35  ;;  %v541_v51 = vadd.f32 %v1445_v47, %v1675_v35 }
  0xd4   :  { %v1307_v52 = vpack.c.bf16 %v786_v48, %v786_v48  ;;  %v1339_v53 = vpack.c.bf16 %v818_v49, %v818_v49  ;;  %vm656_vm4 = vcmp.ge.f32.partialorder %v402_v44, 0.0  ;;  %v720_v54 = vmul.f32 0.2, %v402_v44  ;;  %v404_v55 = vpop.f32.mrf.mxu0  ;;  %v532_v56 = vpop.f32.mrf.mxu1 }
  0xd5   :  { %vm688_vm5 = vcmp.ge.f32.partialorder %v530_v45, 0.0  ;;  %v752_v57 = vmul.f32 0.2, %v530_v45  ;;  %vm659_vm6 = vcmp.ge.f32.partialorder %v413_v50, 0.0  ;;  %v723_v58 = vmul.f32 0.2, %v413_v50 }
  0xd6   :  { %1107 = vst.msk [vmem:[%s2027_s3 + $0x8] sm:$0xf] %vm1104_vm3, %v1307_v52  ;;  %1139 = vst.msk [vmem:[%s2027_s3 + $0x88] sm:$0xf] %vm1104_vm3, %v1339_v53  ;;  %v784_v59 = vsel %vm656_vm4, %v402_v44, %v720_v54  ;;  %vm691_vm7 = vcmp.ge.f32.partialorder %v541_v51, 0.0  ;;  %v405_v61 = vadd.f32 %v1675_v35, %v404_v55  ;;  %v1416_v62 = vpop.f32.mrf.mxu0  ;;  %v1448_v63 = vpop.f32.mrf.mxu1  ;;  %v533_v3 = vadd.f32 %v1675_v35, %v532_v56 }
  0xd7   :  { %v755_v60 = vmul.f32 0.2, %v541_v51  ;;  %v1305_v0 = vpack.c.bf16 %v784_v59, %v784_v59  ;;  %v816_v1 = vsel %vm688_vm5, %v530_v45, %v752_v57  ;;  %v787_v2 = vsel %vm659_vm6, %v413_v50, %v723_v58 }
  0xd8   :  { %v1337_v4 = vpack.c.bf16 %v816_v1, %v816_v1  ;;  %v1308_v5 = vpack.c.bf16 %v787_v2, %v787_v2  ;;  %vm657_vm8 = vcmp.ge.f32.partialorder %v405_v61, 0.0  ;;  %v417_v7 = vpop.f32.mrf.mxu0  ;;  %v545_v8 = vpop.f32.mrf.mxu1  ;;  %v721_v10 = vmul.f32 0.2, %v405_v61 }
  0xd9   :  { %v819_v6 = vsel %vm691_vm7, %v541_v51, %v755_v60  ;;  %1105 = vst.msk [vmem:[%s2027_s3] sm:$0xf] %vm1104_vm3, %v1305_v0  ;;  %vm689_vm9 = vcmp.ge.f32.partialorder %v533_v3, 0.0  ;;  %v753_v11 = vmul.f32 0.2, %v533_v3  ;;  %v426_v12 = vadd.f32 %v1416_v62, %v1675_v35 }
  0xda   :  { %v1340_v9 = vpack.c.bf16 %v819_v6, %v819_v6  ;;  %1137 = vst.msk [vmem:[%s2027_s3 + $0x80] sm:$0xf] %vm1104_vm3, %v1337_v4  ;;  %1108 = vst.msk [vmem:[%s2027_s3 + $0xc] sm:$0xf] %vm1104_vm3, %v1308_v5  ;;  %v554_v13 = vadd.f32 %v1448_v63, %v1675_v35  ;;  %v418_v14 = vadd.f32 %v1675_v35, %v417_v7  ;;  %v1417_v16 = vpop.f32.mrf.mxu0  ;;  %v1449_v17 = vpop.f32.mrf.mxu1 }
  0xdb   :  { %v546_v15 = vadd.f32 %v1675_v35, %v545_v8  ;;  %v785_v18 = vsel %vm657_vm8, %v405_v61, %v721_v10  ;;  %v817_v19 = vsel %vm689_vm9, %v533_v3, %v753_v11  ;;  %v429_v20 = vadd.f32 %v1417_v16, %v1675_v35 }
  0xdc   :  { %1140 = vst.msk [vmem:[%s2027_s3 + $0x8c] sm:$0xf] %vm1104_vm3, %v1340_v9  ;;  %v557_v21 = vadd.f32 %v1449_v17, %v1675_v35  ;;  %v1306_v22 = vpack.c.bf16 %v785_v18, %v785_v18  ;;  %v1338_v23 = vpack.c.bf16 %v817_v19, %v817_v19  ;;  %vm662_vm10 = vcmp.ge.f32.partialorder %v426_v12, 0.0  ;;  %v420_v25 = vpop.f32.mrf.mxu0  ;;  %v548_v26 = vpop.f32.mrf.mxu1 }
  0xdd   :  { %v726_v24 = vmul.f32 0.2, %v426_v12  ;;  %vm694_vm11 = vcmp.ge.f32.partialorder %v554_v13, 0.0  ;;  %v758_v27 = vmul.f32 0.2, %v554_v13  ;;  %vm660_vm12 = vcmp.ge.f32.partialorder %v418_v14, 0.0 }
  0xde   :  { %v724_v28 = vmul.f32 0.2, %v418_v14  ;;  %1106 = vst.msk [vmem:[%s2027_s3 + $0x4] sm:$0xf] %vm1104_vm3, %v1306_v22  ;;  %1138 = vst.msk [vmem:[%s2027_s3 + $0x84] sm:$0xf] %vm1104_vm3, %v1338_v23  ;;  %v1420_v31 = vpop.f32.mrf.mxu0  ;;  %v1452_v32 = vpop.f32.mrf.mxu1  ;;  %v421_v46 = vadd.f32 %v1675_v35, %v420_v25  ;;  %v549_v48 = vadd.f32 %v1675_v35, %v548_v26 }
  0xdf   :  { %v790_v29 = vsel %vm662_vm10, %v426_v12, %v726_v24  ;;  %vm692_vm13 = vcmp.ge.f32.partialorder %v546_v15, 0.0  ;;  %v756_v30 = vmul.f32 0.2, %v546_v15  ;;  %vm663_vm14 = vcmp.ge.f32.partialorder %v429_v20, 0.0 }
  0xe0   :  { %v1311_v33 = vpack.c.bf16 %v790_v29, %v790_v29  ;;  %v822_v34 = vsel %vm694_vm11, %v554_v13, %v758_v27  ;;  %v788_v36 = vsel %vm660_vm12, %v418_v14, %v724_v28  ;;  %v727_v37 = vmul.f32 0.2, %v429_v20  ;;  %v433_v41 = vpop.f32.mrf.mxu0  ;;  %v561_v42 = vpop.f32.mrf.mxu1 }
  0xe1   :  { %v1343_v38 = vpack.c.bf16 %v822_v34, %v822_v34  ;;  %v1309_v39 = vpack.c.bf16 %v788_v36, %v788_v36  ;;  %v820_v40 = vsel %vm692_vm13, %v546_v15, %v756_v30  ;;  %vm695_vm15 = vcmp.ge.f32.partialorder %v557_v21, 0.0 }
  0xe2   :  { %1111 = vst.msk [vmem:[%s2027_s3 + $0x18] sm:$0xf] %vm1104_vm3, %v1311_v33  ;;  %v1341_v43 = vpack.c.bf16 %v820_v40, %v820_v40  ;;  %v791_v44 = vsel %vm663_vm14, %v429_v20, %v727_v37  ;;  %v759_v45 = vmul.f32 0.2, %v557_v21  ;;  %v442_v49 = vadd.f32 %v1420_v31, %v1675_v35  ;;  %v1421_v51 = vpop.f32.mrf.mxu0  ;;  %v1453_v52 = vpop.f32.mrf.mxu1 }
  0xe3   :  { %1143 = vst.msk [vmem:[%s2027_s3 + $0x98] sm:$0xf] %vm1104_vm3, %v1343_v38  ;;  %1109 = vst.msk [vmem:[%s2027_s3 + $0x10] sm:$0xf] %vm1104_vm3, %v1309_v39  ;;  %v1312_v47 = vpack.c.bf16 %v791_v44, %v791_v44  ;;  %v570_v50 = vadd.f32 %v1452_v32, %v1675_v35  ;;  %vm661_vm0 = vcmp.ge.f32.partialorder %v421_v46, 0.0  ;;  %v434_v55 = vadd.f32 %v1675_v35, %v433_v41 }
  0xe4   :  { %1141 = vst.msk [vmem:[%s2027_s3 + $0x90] sm:$0xf] %vm1104_vm3, %v1341_v43  ;;  %v823_v53 = vsel %vm695_vm15, %v557_v21, %v759_v45  ;;  %v725_v54 = vmul.f32 0.2, %v421_v46  ;;  %vm693_vm1 = vcmp.ge.f32.partialorder %v549_v48, 0.0  ;;  %vm666_vm2 = vcmp.ge.f32.partialorder %v442_v49, 0.0  ;;  %v436_v58 = vpop.f32.mrf.mxu0  ;;  %v564_v59 = vpop.f32.mrf.mxu1 }
  0xe5   :  { %1112 = vst.msk [vmem:[%s2027_s3 + $0x1c] sm:$0xf] %vm1104_vm3, %v1312_v47  ;;  %v1344_v56 = vpack.c.bf16 %v823_v53, %v823_v53  ;;  %v757_v57 = vmul.f32 0.2, %v549_v48  ;;  %v730_v61 = vmul.f32 0.2, %v442_v49  ;;  %v562_v7 = vadd.f32 %v1675_v35, %v561_v42 }
  0xe6   :  { %v789_v60 = vsel %vm661_vm0, %v421_v46, %v725_v54  ;;  %vm698_vm4 = vcmp.ge.f32.partialorder %v570_v50, 0.0  ;;  %v762_v62 = vmul.f32 0.2, %v570_v50  ;;  %vm664_vm5 = vcmp.ge.f32.partialorder %v434_v55, 0.0  ;;  %v1424_v2 = vpop.f32.mrf.mxu0  ;;  %v1456_v3 = vpop.f32.mrf.mxu1 }
  0xe7   :  { %1144 = vst.msk [vmem:[%s2027_s3 + $0x9c] sm:$0xf] %vm1104_vm3, %v1344_v56  ;;  %v1310_v63 = vpack.c.bf16 %v789_v60, %v789_v60  ;;  %v821_v0 = vsel %vm693_vm1, %v549_v48, %v757_v57  ;;  %v728_v1 = vmul.f32 0.2, %v434_v55  ;;  %v794_v5 = vsel %vm666_vm2, %v442_v49, %v730_v61 }
  0xe8   :  { %v1342_v4 = vpack.c.bf16 %v821_v0, %v821_v0  ;;  %v826_v6 = vsel %vm698_vm4, %v570_v50, %v762_v62  ;;  %v1315_v8 = vpack.c.bf16 %v794_v5, %v794_v5  ;;  %v445_v11 = vadd.f32 %v1421_v51, %v1675_v35  ;;  %v449_v12 = vpop.f32.mrf.mxu0  ;;  %v577_v13 = vpop.f32.mrf.mxu1 }
  0xe9   :  { %1110 = vst.msk [vmem:[%s2027_s3 + $0x14] sm:$0xf] %vm1104_vm3, %v1310_v63  ;;  %v1347_v9 = vpack.c.bf16 %v826_v6, %v826_v6  ;;  %v792_v10 = vsel %vm664_vm5, %v434_v55, %v728_v1  ;;  %vm696_vm6 = vcmp.ge.f32.partialorder %v562_v7, 0.0  ;;  %v760_v15 = vmul.f32 0.2, %v562_v7 }
  0xea   :  { %1142 = vst.msk [vmem:[%s2027_s3 + $0x94] sm:$0xf] %vm1104_vm3, %v1342_v4  ;;  %v1313_v14 = vpack.c.bf16 %v792_v10, %v792_v10  ;;  %v573_v16 = vadd.f32 %v1453_v52, %v1675_v35  ;;  %1115 = vst.msk [vmem:[%s2027_s3 + $0x28] sm:$0xf] %vm1104_vm3, %v1315_v8  ;;  %vm667_vm7 = vcmp.ge.f32.partialorder %v445_v11, 0.0  ;;  %v437_v18 = vadd.f32 %v1675_v35, %v436_v58  ;;  %v1425_v20 = vpop.f32.mrf.mxu0  ;;  %v1457_v21 = vpop.f32.mrf.mxu1 }
  0xeb   :  { %1147 = vst.msk [vmem:[%s2027_s3 + $0xa8] sm:$0xf] %vm1104_vm3, %v1347_v9  ;;  %v731_v17 = vmul.f32 0.2, %v445_v11  ;;  %v565_v19 = vadd.f32 %v1675_v35, %v564_v59  ;;  %v824_v22 = vsel %vm696_vm6, %v562_v7, %v760_v15  ;;  %v458_v24 = vadd.f32 %v1424_v2, %v1675_v35 }
  0xec   :  { %1113 = vst.msk [vmem:[%s2027_s3 + $0x20] sm:$0xf] %vm1104_vm3, %v1313_v14  ;;  %vm699_vm8 = vcmp.ge.f32.partialorder %v573_v16, 0.0  ;;  %v763_v23 = vmul.f32 0.2, %v573_v16  ;;  %v1345_v25 = vpack.c.bf16 %v824_v22, %v824_v22  ;;  %vm665_vm9 = vcmp.ge.f32.partialorder %v437_v18, 0.0  ;;  %v452_v28 = vpop.f32.mrf.mxu0  ;;  %v580_v29 = vpop.f32.mrf.mxu1 }
  0xed   :  { %v795_v26 = vsel %vm667_vm7, %v445_v11, %v731_v17  ;;  %v729_v27 = vmul.f32 0.2, %v437_v18  ;;  %vm697_vm10 = vcmp.ge.f32.partialorder %v565_v19, 0.0  ;;  %v761_v32 = vmul.f32 0.2, %v565_v19 }
  0xee   :  { %v1316_v30 = vpack.c.bf16 %v795_v26, %v795_v26  ;;  %v827_v31 = vsel %vm699_vm8, %v573_v16, %v763_v23  ;;  %1145 = vst.msk [vmem:[%s2027_s3 + $0xa0] sm:$0xf] %vm1104_vm3, %v1345_v25  ;;  %vm670_vm11 = vcmp.ge.f32.partialorder %v458_v24, 0.0  ;;  %v734_v36 = vmul.f32 0.2, %v458_v24  ;;  %v1428_v37 = vpop.f32.mrf.mxu0  ;;  %v1460_v38 = vpop.f32.mrf.mxu1 }
  0xef   :  { %v1348_v33 = vpack.c.bf16 %v827_v31, %v827_v31  ;;  %v793_v34 = vsel %vm665_vm9, %v437_v18, %v729_v27  ;;  %v825_v40 = vsel %vm697_vm10, %v565_v19, %v761_v32  ;;  %v586_v41 = vadd.f32 %v1456_v3, %v1675_v35 }
  0xf0   :  { %1116 = vst.msk [vmem:[%s2027_s3 + $0x2c] sm:$0xf] %vm1104_vm3, %v1316_v30  ;;  %v1314_v39 = vpack.c.bf16 %v793_v34, %v793_v34  ;;  %v450_v42 = vadd.f32 %v1675_v35, %v449_v12  ;;  %v1346_v43 = vpack.c.bf16 %v825_v40, %v825_v40  ;;  %v798_v44 = vsel %vm670_vm11, %v458_v24, %v734_v36  ;;  %v465_v47 = vpop.f32.mrf.mxu0  ;;  %v593_v48 = vpop.f32.mrf.mxu1 }
  0xf1   :  { %1148 = vst.msk [vmem:[%s2027_s3 + $0xac] sm:$0xf] %vm1104_vm3, %v1348_v33  ;;  %v578_v45 = vadd.f32 %v1675_v35, %v577_v13  ;;  %v461_v46 = vadd.f32 %v1425_v20, %v1675_v35  ;;  %v1319_v49 = vpack.c.bf16 %v798_v44, %v798_v44  ;;  %vm702_vm12 = vcmp.ge.f32.partialorder %v586_v41, 0.0 }
  0xf2   :  { %1114 = vst.msk [vmem:[%s2027_s3 + $0x24] sm:$0xf] %vm1104_vm3, %v1314_v39  ;;  %v766_v50 = vmul.f32 0.2, %v586_v41  ;;  %vm668_vm13 = vcmp.ge.f32.partialorder %v450_v42, 0.0  ;;  %v1429_v53 = vpop.f32.mrf.mxu0  ;;  %v1461_v54 = vpop.f32.mrf.mxu1  ;;  %v589_v57 = vadd.f32 %v1457_v21, %v1675_v35  ;;  %v453_v58 = vadd.f32 %v1675_v35, %v452_v28 }
  0xf3   :  { %1146 = vst.msk [vmem:[%s2027_s3 + $0xa4] sm:$0xf] %vm1104_vm3, %v1346_v43  ;;  %v732_v51 = vmul.f32 0.2, %v450_v42  ;;  %vm700_vm14 = vcmp.ge.f32.partialorder %v578_v45, 0.0  ;;  %vm671_vm15 = vcmp.ge.f32.partialorder %v461_v46, 0.0  ;;  %v581_v62 = vadd.f32 %v1675_v35, %v580_v29 }
  0xf4   :  { %v764_v52 = vmul.f32 0.2, %v578_v45  ;;  %1119 = vst.msk [vmem:[%s2027_s3 + $0x38] sm:$0xf] %vm1104_vm3, %v1319_v49  ;;  %v830_v55 = vsel %vm702_vm12, %v586_v41, %v766_v50  ;;  %v735_v56 = vmul.f32 0.2, %v461_v46  ;;  %v1811_v63 = vpop.f32.mrf.mxu0  ;;  %v1813_v0 = vpop.f32.mrf.mxu1  ;;  %v474_v10 = vadd.f32 %v1428_v37, %v1675_v35 }
  0xf5   :  { %v1351_v59 = vpack.c.bf16 %v830_v55, %v830_v55  ;;  %v796_v60 = vsel %vm668_vm13, %v450_v42, %v732_v51  ;;  %vm703_vm0 = vcmp.ge.f32.partialorder %v589_v57, 0.0  ;;  %v767_v5 = vmul.f32 0.2, %v589_v57 }
  0xf6   :  { %v828_v61 = vsel %vm700_vm14, %v578_v45, %v764_v52  ;;  %v1317_v1 = vpack.c.bf16 %v796_v60, %v796_v60  ;;  %v799_v3 = vsel %vm671_vm15, %v461_v46, %v735_v56  ;;  %vm669_vm1 = vcmp.ge.f32.partialorder %v453_v58, 0.0  ;;  %v1432_v7 = vpop.f32.mrf.mxu0  ;;  %v1464_v8 = vpop.f32.mrf.mxu1 }
  0xf7   :  { %v1349_v2 = vpack.c.bf16 %v828_v61, %v828_v61  ;;  %1151 = vst.msk [vmem:[%s2027_s3 + $0xb8] sm:$0xf] %vm1104_vm3, %v1351_v59  ;;  %v1320_v4 = vpack.c.bf16 %v799_v3, %v799_v3  ;;  %v733_v6 = vmul.f32 0.2, %v453_v58  ;;  %vm701_vm2 = vcmp.ge.f32.partialorder %v581_v62, 0.0 }
  0xf8   :  { %1117 = vst.msk [vmem:[%s2027_s3 + $0x30] sm:$0xf] %vm1104_vm3, %v1317_v1  ;;  %v765_v9 = vmul.f32 0.2, %v581_v62  ;;  %v602_v11 = vadd.f32 %v1460_v38, %v1675_v35  ;;  %v831_v12 = vsel %vm703_vm0, %v589_v57, %v767_v5  ;;  %v466_v14 = vadd.f32 %v1675_v35, %v465_v47  ;;  %v481_v16 = vpop.f32.mrf.mxu0  ;;  %v1836_v17 = vpop.f32.mrf.mxu1 }
  0xf9   :  { %1149 = vst.msk [vmem:[%s2027_s3 + $0xb0] sm:$0xf] %vm1104_vm3, %v1349_v2  ;;  %1120 = vst.msk [vmem:[%s2027_s3 + $0x3c] sm:$0xf] %vm1104_vm3, %v1320_v4  ;;  %v797_v13 = vsel %vm669_vm1, %v453_v58, %v733_v6  ;;  %v594_v15 = vadd.f32 %v1675_v35, %v593_v48  ;;  %v1352_v18 = vpack.c.bf16 %v831_v12, %v831_v12  ;;  %vm674_vm4 = vcmp.ge.f32.partialorder %v474_v10, 0.0 }
  0xfa   :  { %v1318_v19 = vpack.c.bf16 %v797_v13, %v797_v13  ;;  %v829_v20 = vsel %vm701_vm2, %v581_v62, %v765_v9  ;;  %v738_v22 = vmul.f32 0.2, %v474_v10  ;;  %vm706_vm5 = vcmp.ge.f32.partialorder %v602_v11, 0.0  ;;  %v1838_v24 = vpop.f32.mrf.mxu0  ;;  %v1840_v25 = vpop.f32.mrf.mxu1 }
  0xfb   :  { %v1350_v21 = vpack.c.bf16 %v829_v20, %v829_v20  ;;  %v770_v23 = vmul.f32 0.2, %v602_v11  ;;  %1152 = vst.msk [vmem:[%s2027_s3 + $0xbc] sm:$0xf] %vm1104_vm3, %v1352_v18  ;;  %vm672_vm6 = vcmp.ge.f32.partialorder %v466_v14, 0.0  ;;  %vm704_vm7 = vcmp.ge.f32.partialorder %v594_v15, 0.0 }
  0xfc   :  { %1118 = vst.msk [vmem:[%s2027_s3 + $0x34] sm:$0xf] %vm1104_vm3, %v1318_v19  ;;  %v736_v26 = vmul.f32 0.2, %v466_v14  ;;  %v768_v27 = vmul.f32 0.2, %v594_v15  ;;  %v802_v28 = vsel %vm674_vm4, %v474_v10, %v738_v22  ;;  %v477_v30 = vadd.f32 %v1429_v53, %v1675_v35  ;;  %v1856_v32 = vpop.f32.mrf.mxu0  ;;  %v1858_v33 = vpop.f32.mrf.mxu1 }
  0xfd   :  { %1150 = vst.msk [vmem:[%s2027_s3 + $0xb4] sm:$0xf] %vm1104_vm3, %v1350_v21  ;;  %v834_v29 = vsel %vm706_vm5, %v602_v11, %v770_v23  ;;  %v605_v31 = vadd.f32 %v1461_v54, %v1675_v35  ;;  %v1323_v34 = vpack.c.bf16 %v802_v28, %v802_v28  ;;  %v469_v45 = vadd.f32 %v1675_v35, %v1811_v63 }
  0xfe   :  { %v1355_v36 = vpack.c.bf16 %v834_v29, %v834_v29  ;;  %v800_v37 = vsel %vm672_vm6, %v466_v14, %v736_v26  ;;  %v832_v38 = vsel %vm704_vm7, %v594_v15, %v768_v27  ;;  %vm675_vm8 = vcmp.ge.f32.partialorder %v477_v30, 0.0  ;;  %v1436_v42 = vpop.f32.mrf.mxu0  ;;  %v1860_v43 = vpop.f32.mrf.mxu1 }
  0xff   :  { %v1321_v39 = vpack.c.bf16 %v800_v37, %v800_v37  ;;  %v1353_v40 = vpack.c.bf16 %v832_v38, %v832_v38  ;;  %v739_v41 = vmul.f32 0.2, %v477_v30  ;;  %1123 = vst.msk [vmem:[%s2027_s3 + $0x48] sm:$0xf] %vm1104_vm3, %v1323_v34  ;;  %vm707_vm9 = vcmp.ge.f32.partialorder %v605_v31, 0.0 }
 0x100   :  { %1155 = vst.msk [vmem:[%s2027_s3 + $0xc8] sm:$0xf] %vm1104_vm3, %v1355_v36  ;;  %v771_v44 = vmul.f32 0.2, %v605_v31  ;;  %v597_v46 = vadd.f32 %v1675_v35, %v1813_v0  ;;  %v490_v48 = vadd.f32 %v1432_v7, %v1675_v35  ;;  %v618_v49 = vadd.f32 %v1464_v8, %v1675_v35  ;;  %v497_v56 = vpop.f32.mrf.mxu0  ;;  %v625_v57 = vpop.f32.mrf.mxu1 }
 0x101   :  { %1121 = vst.msk [vmem:[%s2027_s3 + $0x40] sm:$0xf] %vm1104_vm3, %v1321_v39  ;;  %1153 = vst.msk [vmem:[%s2027_s3 + $0xc0] sm:$0xf] %vm1104_vm3, %v1353_v40  ;;  %v803_v47 = vsel %vm675_vm8, %v477_v30, %v739_v41  ;;  %v482_v50 = vadd.f32 %v1675_v35, %v481_v16  ;;  %vm673_vm10 = vcmp.ge.f32.partialorder %v469_v45, 0.0  ;;  %v610_v3 = vadd.f32 %v1675_v35, %v1836_v17 }
 0x102   :  { %v1324_v51 = vpack.c.bf16 %v803_v47, %v803_v47  ;;  %v835_v52 = vsel %vm707_vm9, %v605_v31, %v771_v44  ;;  %v737_v53 = vmul.f32 0.2, %v469_v45  ;;  %vm705_vm11 = vcmp.ge.f32.partialorder %v597_v46, 0.0  ;;  %v1437_v8 = vpop.f32.mrf.mxu0  ;;  %v1469_v9 = vpop.f32.mrf.mxu1 }
 0x103   :  { %v1356_v54 = vpack.c.bf16 %v835_v52, %v835_v52  ;;  %v769_v55 = vmul.f32 0.2, %v597_v46  ;;  %vm678_vm12 = vcmp.ge.f32.partialorder %v490_v48, 0.0  ;;  %v742_v59 = vmul.f32 0.2, %v490_v48 }
 0x104   :  { %1124 = vst.msk [vmem:[%s2027_s3 + $0x4c] sm:$0xf] %vm1104_vm3, %v1324_v51  ;;  %v801_v58 = vsel %vm673_vm10, %v469_v45, %v737_v53  ;;  %vm710_vm13 = vcmp.ge.f32.partialorder %v618_v49, 0.0  ;;  %v774_v60 = vmul.f32 0.2, %v618_v49  ;;  %vm676_vm14 = vcmp.ge.f32.partialorder %v482_v50, 0.0  ;;  %v500_v22 = vpop.f32.mrf.mxu0  ;;  %v628_v23 = vpop.f32.mrf.mxu1 }
 0x105   :  { %1156 = vst.msk [vmem:[%s2027_s3 + $0xcc] sm:$0xf] %vm1104_vm3, %v1356_v54  ;;  %v1322_v61 = vpack.c.bf16 %v801_v58, %v801_v58  ;;  %v833_v62 = vsel %vm705_vm11, %v597_v46, %v769_v55  ;;  %v740_v63 = vmul.f32 0.2, %v482_v50  ;;  %v806_v1 = vsel %vm678_vm12, %v490_v48, %v742_v59 }
 0x106   :  { %v1354_v0 = vpack.c.bf16 %v833_v62, %v833_v62  ;;  %v838_v2 = vsel %vm710_vm13, %v618_v49, %v774_v60  ;;  %v1327_v4 = vpack.c.bf16 %v806_v1, %v806_v1  ;;  %v493_v7 = vadd.f32 %v1838_v24, %v1675_v35  ;;  %v1440_v39 = vpop.f32.mrf.mxu0  ;;  %v1472_v40 = vpop.f32.mrf.mxu1 }
 0x107   :  { %1122 = vst.msk [vmem:[%s2027_s3 + $0x44] sm:$0xf] %vm1104_vm3, %v1322_v61  ;;  %v1359_v5 = vpack.c.bf16 %v838_v2, %v838_v2  ;;  %v804_v6 = vsel %vm676_vm14, %v482_v50, %v740_v63  ;;  %vm708_vm15 = vcmp.ge.f32.partialorder %v610_v3, 0.0  ;;  %v772_v11 = vmul.f32 0.2, %v610_v3 }
 0x108   :  { %1154 = vst.msk [vmem:[%s2027_s3 + $0xc4] sm:$0xf] %vm1104_vm3, %v1354_v0  ;;  %v1325_v10 = vpack.c.bf16 %v804_v6, %v804_v6  ;;  %v621_v12 = vadd.f32 %v1840_v25, %v1675_v35  ;;  %1127 = vst.msk [vmem:[%s2027_s3 + $0x58] sm:$0xf] %vm1104_vm3, %v1327_v4  ;;  %vm679_vm0 = vcmp.ge.f32.partialorder %v493_v7, 0.0  ;;  %v485_v14 = vadd.f32 %v1675_v35, %v1856_v32  ;;  %v513_v53 = vpop.f32.mrf.mxu0  ;;  %v641_v54 = vpop.f32.mrf.mxu1 }
 0x109   :  { %1159 = vst.msk [vmem:[%s2027_s3 + $0xd8] sm:$0xf] %vm1104_vm3, %v1359_v5  ;;  %v743_v13 = vmul.f32 0.2, %v493_v7  ;;  %v613_v15 = vadd.f32 %v1675_v35, %v1858_v33  ;;  %v836_v16 = vsel %vm708_vm15, %v610_v3, %v772_v11  ;;  %v506_v18 = vadd.f32 %v1436_v42, %v1675_v35 }
 0x10a   :  { %1125 = vst.msk [vmem:[%s2027_s3 + $0x50] sm:$0xf] %vm1104_vm3, %v1325_v10  ;;  %vm711_vm1 = vcmp.ge.f32.partialorder %v621_v12, 0.0  ;;  %v775_v17 = vmul.f32 0.2, %v621_v12  ;;  %v1357_v19 = vpack.c.bf16 %v836_v16, %v836_v16  ;;  %vm677_vm2 = vcmp.ge.f32.partialorder %v485_v14, 0.0  ;;  %v1441_v4 = vpop.f32.mrf.mxu0  ;;  %v1473_v5 = vpop.f32.mrf.mxu1 }
 0x10b   :  { %v807_v20 = vsel %vm679_vm0, %v493_v7, %v743_v13  ;;  %v741_v21 = vmul.f32 0.2, %v485_v14  ;;  %vm709_vm4 = vcmp.ge.f32.partialorder %v613_v15, 0.0  ;;  %v773_v26 = vmul.f32 0.2, %v613_v15 }
 0x10c   :  { %v1328_v24 = vpack.c.bf16 %v807_v20, %v807_v20  ;;  %v839_v25 = vsel %vm711_vm1, %v621_v12, %v775_v17  ;;  %1157 = vst.msk [vmem:[%s2027_s3 + $0xd0] sm:$0xf] %vm1104_vm3, %v1357_v19  ;;  %vm682_vm5 = vcmp.ge.f32.partialorder %v506_v18, 0.0  ;;  %v746_v29 = vmul.f32 0.2, %v506_v18  ;;  %v644_v19 = vpop.f32.mrf.mxu1 }
 0x10d   :  { %v1360_v27 = vpack.c.bf16 %v839_v25, %v839_v25  ;;  %v805_v28 = vsel %vm677_vm2, %v485_v14, %v741_v21  ;;  %v837_v31 = vsel %vm709_vm4, %v613_v15, %v773_v26  ;;  %v634_v32 = vadd.f32 %v1860_v43, %v1675_v35 }
 0x10e   :  { %1128 = vst.msk [vmem:[%s2027_s3 + $0x5c] sm:$0xf] %vm1104_vm3, %v1328_v24  ;;  %v1326_v30 = vpack.c.bf16 %v805_v28, %v805_v28  ;;  %v498_v33 = vadd.f32 %v1675_v35, %v497_v56  ;;  %v1358_v34 = vpack.c.bf16 %v837_v31, %v837_v31  ;;  %v810_v36 = vsel %vm682_vm5, %v506_v18, %v746_v29  ;;  %v516_v18 = vpop.f32.mrf.mxu0 }
 0x10f   :  { %1160 = vst.msk [vmem:[%s2027_s3 + $0xdc] sm:$0xf] %vm1104_vm3, %v1360_v27  ;;  %v626_v37 = vadd.f32 %v1675_v35, %v625_v57  ;;  %v509_v38 = vadd.f32 %v1437_v8, %v1675_v35  ;;  %v1331_v41 = vpack.c.bf16 %v810_v36, %v810_v36  ;;  %vm714_vm6 = vcmp.ge.f32.partialorder %v634_v32, 0.0 }
 0x110   :  { %1126 = vst.msk [vmem:[%s2027_s3 + $0x54] sm:$0xf] %vm1104_vm3, %v1326_v30  ;;  %v778_v42 = vmul.f32 0.2, %v634_v32  ;;  %vm680_vm7 = vcmp.ge.f32.partialorder %v498_v33, 0.0  ;;  %v637_v47 = vadd.f32 %v1469_v9, %v1675_v35  ;;  %v501_v48 = vadd.f32 %v1675_v35, %v500_v22 }
 0x111   :  { %1158 = vst.msk [vmem:[%s2027_s3 + $0xd4] sm:$0xf] %vm1104_vm3, %v1358_v34  ;;  %v744_v43 = vmul.f32 0.2, %v498_v33  ;;  %vm712_vm8 = vcmp.ge.f32.partialorder %v626_v37, 0.0  ;;  %vm683_vm9 = vcmp.ge.f32.partialorder %v509_v38, 0.0  ;;  %v629_v52 = vadd.f32 %v1675_v35, %v628_v23 }
 0x112   :  { %v776_v44 = vmul.f32 0.2, %v626_v37  ;;  %1131 = vst.msk [vmem:[%s2027_s3 + $0x68] sm:$0xf] %vm1104_vm3, %v1331_v41  ;;  %v842_v45 = vsel %vm714_vm6, %v634_v32, %v778_v42  ;;  %v747_v46 = vmul.f32 0.2, %v509_v38  ;;  %v522_v62 = vadd.f32 %v1440_v39, %v1675_v35 }
 0x113   :  { %v1363_v49 = vpack.c.bf16 %v842_v45, %v842_v45  ;;  %v808_v50 = vsel %vm680_vm7, %v498_v33, %v744_v43  ;;  %vm715_vm10 = vcmp.ge.f32.partialorder %v637_v47, 0.0  ;;  %v779_v59 = vmul.f32 0.2, %v637_v47 }
 0x114   :  { %v840_v51 = vsel %vm712_vm8, %v626_v37, %v776_v44  ;;  %v1329_v55 = vpack.c.bf16 %v808_v50, %v808_v50  ;;  %v811_v57 = vsel %vm683_vm9, %v509_v38, %v747_v46  ;;  %vm681_vm11 = vcmp.ge.f32.partialorder %v501_v48, 0.0 }
 0x115   :  { %v1361_v56 = vpack.c.bf16 %v840_v51, %v840_v51  ;;  %1163 = vst.msk [vmem:[%s2027_s3 + $0xe8] sm:$0xf] %vm1104_vm3, %v1363_v49  ;;  %v1332_v58 = vpack.c.bf16 %v811_v57, %v811_v57  ;;  %v745_v60 = vmul.f32 0.2, %v501_v48  ;;  %vm713_vm12 = vcmp.ge.f32.partialorder %v629_v52, 0.0 }
 0x116   :  { %1129 = vst.msk [vmem:[%s2027_s3 + $0x60] sm:$0xf] %vm1104_vm3, %v1329_v55  ;;  %v777_v61 = vmul.f32 0.2, %v629_v52  ;;  %v650_v63 = vadd.f32 %v1472_v40, %v1675_v35  ;;  %v843_v0 = vsel %vm715_vm10, %v637_v47, %v779_v59  ;;  %v514_v2 = vadd.f32 %v1675_v35, %v513_v53 }
 0x117   :  { %1161 = vst.msk [vmem:[%s2027_s3 + $0xe0] sm:$0xf] %vm1104_vm3, %v1361_v56  ;;  %1132 = vst.msk [vmem:[%s2027_s3 + $0x6c] sm:$0xf] %vm1104_vm3, %v1332_v58  ;;  %v809_v1 = vsel %vm681_vm11, %v501_v48, %v745_v60  ;;  %v642_v3 = vadd.f32 %v1675_v35, %v641_v54  ;;  %v1364_v6 = vpack.c.bf16 %v843_v0, %v843_v0  ;;  %vm686_vm13 = vcmp.ge.f32.partialorder %v522_v62, 0.0 }
 0x118   :  { %v1330_v7 = vpack.c.bf16 %v809_v1, %v809_v1  ;;  %v841_v8 = vsel %vm713_vm12, %v629_v52, %v777_v61  ;;  %v750_v10 = vmul.f32 0.2, %v522_v62  ;;  %vm718_vm14 = vcmp.ge.f32.partialorder %v650_v63, 0.0 }
 0x119   :  { %v1362_v9 = vpack.c.bf16 %v841_v8, %v841_v8  ;;  %v782_v11 = vmul.f32 0.2, %v650_v63  ;;  %1164 = vst.msk [vmem:[%s2027_s3 + $0xec] sm:$0xf] %vm1104_vm3, %v1364_v6  ;;  %vm684_vm15 = vcmp.ge.f32.partialorder %v514_v2, 0.0  ;;  %vm716_vm0 = vcmp.ge.f32.partialorder %v642_v3, 0.0 }
 0x11a   :  { %1130 = vst.msk [vmem:[%s2027_s3 + $0x64] sm:$0xf] %vm1104_vm3, %v1330_v7  ;;  %v748_v12 = vmul.f32 0.2, %v514_v2  ;;  %v780_v13 = vmul.f32 0.2, %v642_v3  ;;  %v814_v14 = vsel %vm686_vm13, %v522_v62, %v750_v10  ;;  %v525_v16 = vadd.f32 %v1441_v4, %v1675_v35 }
 0x11b   :  { %1162 = vst.msk [vmem:[%s2027_s3 + $0xe4] sm:$0xf] %vm1104_vm3, %v1362_v9  ;;  %v846_v15 = vsel %vm718_vm14, %v650_v63, %v782_v11  ;;  %v653_v17 = vadd.f32 %v1473_v5, %v1675_v35  ;;  %v1335_v20 = vpack.c.bf16 %v814_v14, %v814_v14  ;;  %v517_v28 = vadd.f32 %v1675_v35, %v516_v18 }
 0x11c   :  { %v1367_v21 = vpack.c.bf16 %v846_v15, %v846_v15  ;;  %v812_v22 = vsel %vm684_vm15, %v514_v2, %v748_v12  ;;  %v844_v23 = vsel %vm716_vm0, %v642_v3, %v780_v13  ;;  %vm687_vm1 = vcmp.ge.f32.partialorder %v525_v16, 0.0 }
 0x11d   :  { %v1333_v24 = vpack.c.bf16 %v812_v22, %v812_v22  ;;  %v1365_v25 = vpack.c.bf16 %v844_v23, %v844_v23  ;;  %v751_v26 = vmul.f32 0.2, %v525_v16  ;;  %1135 = vst.msk [vmem:[%s2027_s3 + $0x78] sm:$0xf] %vm1104_vm3, %v1335_v20  ;;  %vm719_vm2 = vcmp.ge.f32.partialorder %v653_v17, 0.0 }
 0x11e   :  { %1167 = vst.msk [vmem:[%s2027_s3 + $0xf8] sm:$0xf] %vm1104_vm3, %v1367_v21  ;;  %v783_v27 = vmul.f32 0.2, %v653_v17  ;;  %v645_v29 = vadd.f32 %v1675_v35, %v644_v19  ;;  %vm685_vm4 = vcmp.ge.f32.partialorder %v517_v28, 0.0 }
 0x11f   :  { %1133 = vst.msk [vmem:[%s2027_s3 + $0x70] sm:$0xf] %vm1104_vm3, %v1333_v24  ;;  %1165 = vst.msk [vmem:[%s2027_s3 + $0xf0] sm:$0xf] %vm1104_vm3, %v1365_v25  ;;  %v815_v30 = vsel %vm687_vm1, %v525_v16, %v751_v26  ;;  %v749_v33 = vmul.f32 0.2, %v517_v28 }
 0x120   :  { %v1336_v31 = vpack.c.bf16 %v815_v30, %v815_v30  ;;  %v847_v32 = vsel %vm719_vm2, %v653_v17, %v783_v27  ;;  %vm717_vm5 = vcmp.ge.f32.partialorder %v645_v29, 0.0  ;;  %v781_v36 = vmul.f32 0.2, %v645_v29 }
 0x121   :  { %v1368_v34 = vpack.c.bf16 %v847_v32, %v847_v32  ;;  %v813_v35 = vsel %vm685_vm4, %v517_v28, %v749_v33 }
 0x122   :  { %1136 = vst.msk [vmem:[%s2027_s3 + $0x7c] sm:$0xf] %vm1104_vm3, %v1336_v31  ;;  %v1334_v37 = vpack.c.bf16 %v813_v35, %v813_v35  ;;  %v845_v38 = vsel %vm717_vm5, %v645_v29, %v781_v36 }
 0x123   :  { %1168 = vst.msk [vmem:[%s2027_s3 + $0xfc] sm:$0xf] %vm1104_vm3, %v1368_v34  ;;  %v1366_v39 = vpack.c.bf16 %v845_v38, %v845_v38 }
 0x124   :  { %1134 = vst.msk [vmem:[%s2027_s3 + $0x74] sm:$0xf] %vm1104_vm3, %v1334_v37 }
 0x125   :  { %1166 = vst.msk [vmem:[%s2027_s3 + $0xf4] sm:$0xf] %vm1104_vm3, %v1366_v39 }

</bundles_post_ra>
